<compile_context>
chip_gen: v5e
topology: v5e:2x2
jax: 0.10.0
libtpu: 0.0.40
codegen_flags: <defaults>
</compile_context>

<pallas_src>
import functools

import jax
import jax.numpy as jnp
from jax.experimental import pallas as pl
from jax.experimental.pallas import tpu as pltpu


def autopad(k, p=None):
    if p is None:
        p = k // 2 if isinstance(k, int) else [x // 2 for x in k]
    return p


# ---------------------------------------------------------------------------
# Fused (per-tap matmul accumulation + BN bias + SiLU) Pallas kernel
# ---------------------------------------------------------------------------
def _fused_conv_bn_silu_kernel(*refs, num_taps, apply_act):
    # refs = tap_0 ... tap_{T-1}, w, b, out
    #   tap_t : (C1, TP)  bf16   (pixels on lanes)
    #   w     : (T, c2, C1) bf16 (BN scale folded)
    #   b     : (c2, 1)  f32     (folded BN bias)
    #   out   : (c2, TP) f32
    tap_refs = refs[:num_taps]
    w_ref = refs[num_taps]
    b_ref = refs[num_taps + 1]
    o_ref = refs[num_taps + 2]

    acc = jnp.dot(w_ref[0], tap_refs[0][...], preferred_element_type=jnp.float32)
    for t in range(1, num_taps):
        acc = acc + jnp.dot(w_ref[t], tap_refs[t][...],
                            preferred_element_type=jnp.float32)

    y = acc + b_ref[...]                      # folded BatchNorm bias (eval mode)
    if apply_act:
        # SiLU: y * sigmoid(y); reciprocal goes to the EUP slot.
        y = y * pl.reciprocal(1.0 + jnp.exp(-y), approx=True)
    o_ref[...] = y.astype(o_ref.dtype)


def _choose_pixel_tile(P, c1, c2, num_taps, n_batch, vmem_budget=24 << 20):
    """Pick a lane-dense pixel tile that fits a VMEM budget and keeps >=4 grid steps."""
    if P <= 128:
        return P                       # full-dim block is always legal
    # Double-buffered bf16 tap blocks + double-buffered f32 output block, per pixel.
    per_pixel = 2 * (num_taps * c1 * 2 + c2 * 4)
    tp = max(128, vmem_budget // per_pixel)
    min_tiles = -(-4 // n_batch)       # aim for >= 4 total grid steps (v7x megacore)
    tp = min(tp, max(128, P // min_tiles))
    tp = (tp // 128) * 128             # lane-dense
    return min(tp, P) if tp < P else P


def fused_taps_matmul_bias_silu(taps, w_taps, bias, *, act=True,
                                vmem_budget=24 << 20):
    """out[n, :, j] = act(sum_t w_taps[t] @ taps[t][n, :, j] + bias)."""
    num_taps = len(taps)
    N, C1, P = taps[0].shape
    c2 = w_taps.shape[1]

    tp = _choose_pixel_tile(P, C1, c2, num_taps, N, vmem_budget)
    grid = (N, pl.cdiv(P, tp))

    tap_spec = pl.BlockSpec((None, C1, tp), lambda n, j: (n, 0, j))
    in_specs = [tap_spec] * num_taps + [
        pl.BlockSpec((num_taps, c2, C1), lambda n, j: (0, 0, 0)),  # resident weight
        pl.BlockSpec((c2, 1), lambda n, j: (0, 0)),                # resident bias
    ]
    out_spec = pl.BlockSpec((None, c2, tp), lambda n, j: (n, 0, j))

    flops = 2 * num_taps * C1 * c2 * N * P
    bytes_accessed = (num_taps * N * C1 * P * 2      # bf16 tap reads
                      + num_taps * c2 * C1 * 2       # bf16 weight
                      + c2 * 4                       # f32 bias
                      + N * c2 * P * 4)              # f32 output
    cost = pl.CostEstimate(flops=flops,
                           transcendentals=(N * P * c2 if act else 0),
                           bytes_accessed=bytes_accessed)

    return pl.pallas_call(
        functools.partial(_fused_conv_bn_silu_kernel,
                          num_taps=num_taps, apply_act=act),
        out_shape=jax.ShapeDtypeStruct((N, c2, P), jnp.float32),
        grid_spec=pltpu.PrefetchScalarGridSpec(
            num_scalar_prefetch=0,
            grid=grid,
            in_specs=in_specs,
            out_specs=out_spec,
        ),
        compiler_params=pltpu.CompilerParams(
            dimension_semantics=("parallel", "parallel"),
            vmem_limit_bytes=48 * 1024 * 1024,
        ),
        cost_estimate=cost,
    )(*taps, w_taps, bias)


# ---------------------------------------------------------------------------
# Conv_2d forward (wrapper) — stays in NCHW end to end, no transposes.
# ---------------------------------------------------------------------------
def conv2d_bn_silu_forward(x_nchw, conv_w, gamma, beta, rmean, rvar,
                           *, k=1, s=1, p=None, g=1, d=1, act=True, eps=1e-5):
    """Pallas Conv_2d.forward.  BatchNorm uses running stats (eval mode only)."""
    if p is None:
        p = autopad(k, None)
    if g != 1:
        raise NotImplementedError("grouped conv (g>1) not implemented")  # TODO(synk)

    N, C1, H, W = x_nchw.shape
    c2 = conv_w.shape[0]

    # Fold BN (eval mode): scale into the weight, bias alone enters the kernel.
    scale = gamma.astype(jnp.float32) / jnp.sqrt(rvar.astype(jnp.float32) + eps)
    bias = beta.astype(jnp.float32) - rmean.astype(jnp.float32) * scale
    # (c2, c1, kh, kw) -> (kh*kw, c2, c1), BN scale folded per output channel.
    w_taps = jnp.transpose(conv_w.astype(jnp.float32), (2, 3, 0, 1)).reshape(k * k, c2, C1)
    w_taps = (w_taps * scale[None, :, None]).astype(jnp.bfloat16)

    out_h = (H + 2 * p - d * (k - 1) - 1) // s + 1
    out_w = (W + 2 * p - d * (k - 1) - 1) // s + 1
    P = out_h * out_w

    # bf16 activations (the kernel accumulates in f32).
    x = x_nchw.astype(jnp.bfloat16)
    if p > 0:
        x = jnp.pad(x, ((0, 0), (0, 0), (p, p), (p, p)))

    # One (N, C1, out_h*out_w) view per conv tap.  For the default k=1/s=1/p=0
    # this is a single reshape: no im2col, no transpose, no data duplication.
    taps = []
    for dy in range(k):
        for dx in range(k):
            t = x[:, :,
                  dy * d: dy * d + (out_h - 1) * s + 1: s,
                  dx * d: dx * d + (out_w - 1) * s + 1: s]
            taps.append(t.reshape(N, C1, P))

    y = fused_taps_matmul_bias_silu(taps, w_taps, bias.reshape(c2, 1), act=act)
    return y.reshape(N, c2, out_h, out_w)       # already NCHW — no output transpose


# ---------------------------------------------------------------------------
# Pure-JAX reference (independent path, for correctness check)
# ---------------------------------------------------------------------------
def conv2d_bn_silu_reference(x_nchw, conv_w, gamma, beta, rmean, rvar,
                             *, k=1, s=1, p=None, g=1, d=1, act=True, eps=1e-5):
    if p is None:
        p = autopad(k, None)
    y = jax.lax.conv_general_dilated(
        x_nchw.astype(jnp.float32), conv_w.astype(jnp.float32),
        window_strides=(s, s), padding=[(p, p), (p, p)],
        rhs_dilation=(d, d),
        dimension_numbers=("NCHW", "OIHW", "NCHW"),
        feature_group_count=g)
    scale = gamma / jnp.sqrt(rvar + eps)
    bias = beta - rmean * scale
    y = y * scale[None, :, None, None] + bias[None, :, None, None]
    if act:
        y = y * jax.nn.sigmoid(y)
    return y


# ---------------------------------------------------------------------------
if __name__ == "__main__":
    key = jax.random.PRNGKey(0)
    keys = jax.random.split(key, 11)

    N, c1, H, W = 2, 4, 16, 16
    c2 = 8

    x = jax.random.normal(keys[0], (N, c1, H, W), jnp.float32)

    def make_bn(kg, kb, km, kv, c):
        gamma = 0.5 + jax.random.uniform(kg, (c,), jnp.float32)
        beta = 0.1 * jax.random.normal(kb, (c,), jnp.float32)
        rmean = 0.1 * jax.random.normal(km, (c,), jnp.float32)
        rvar = 0.5 + jax.random.uniform(kv, (c,), jnp.float32)
        return gamma, beta, rmean, rvar

    # bf16 operands + approx-reciprocal sigmoid -> loosened tolerance.
    RTOL, ATOL = 2e-2, 2e-2

    # --- default Conv_2d: k=1, s=1, p=autopad(1)=0 ------------------------
    w1 = 0.1 * jax.random.normal(keys[1], (c2, c1, 1, 1), jnp.float32)
    bn1 = make_bn(keys[2], keys[3], keys[4], keys[5], c2)

    out1 = jax.block_until_ready(conv2d_bn_silu_forward(x, w1, *bn1, k=1))
    assert out1.shape == (N, c2, H, W), out1.shape
    ref1 = jax.block_until_ready(conv2d_bn_silu_reference(x, w1, *bn1, k=1))
    assert jnp.allclose(out1, ref1, rtol=RTOL, atol=ATOL), "k=1 mismatch vs reference"

    # --- k=3 (autopad=1, same spatial size) via in-kernel tap accumulation --
    w3 = 0.1 * jax.random.normal(keys[6], (c2, c1, 3, 3), jnp.float32)
    bn3 = make_bn(keys[7], keys[8], keys[9], keys[10], c2)

    out3 = jax.block_until_ready(conv2d_bn_silu_forward(x, w3, *bn3, k=3))
    assert out3.shape == (N, c2, H, W), out3.shape
    ref3 = jax.block_until_ready(conv2d_bn_silu_reference(x, w3, *bn3, k=3))
    assert jnp.allclose(out3, ref3, rtol=RTOL, atol=ATOL), "k=3 mismatch vs reference"

    print("KERNEL_OK")
</pallas_src>

<mosaic_0001>
module attributes {stable_mosaic.version = 11 : i64} {
  func.func @_fused_conv_bn_silu_kernel(%arg0: i32, %arg1: i32, %arg2: memref<1x4x128xbf16, #tpu.memory_space<vmem>>, %arg3: memref<1x8x4xbf16, #tpu.memory_space<vmem>>, %arg4: memref<8x1xf32, #tpu.memory_space<vmem>>, %arg5: memref<1x8x128xf32, #tpu.memory_space<vmem>>) attributes {dimension_semantics = [#tpu.dimension_semantics<parallel>, #tpu.dimension_semantics<parallel>], iteration_bounds = array<i64: 2, 2>, scalar_prefetch = 0 : i64, scratch_operands = 0 : i64, tpu.core_type = #tpu.core_type<tc>, window_params = [{transform_indices = @transform_0, window_bounds = array<i64: 1, 4, 128>}, {pipeline_mode = #tpu.pipeline_mode<synchronous>, transform_indices = @transform_1, window_bounds = array<i64: 1, 8, 4>}, {pipeline_mode = #tpu.pipeline_mode<synchronous>, transform_indices = @transform_2, window_bounds = array<i64: 8, 1>}, {transform_indices = @transform_3, window_bounds = array<i64: 1, 8, 128>}]} {
    %c0 = arith.constant 0 : index
    %c0_0 = arith.constant 0 : index
    %c0_1 = arith.constant 0 : index
    %0 = vector.load %arg3[%c0, %c0_0, %c0_1] : memref<1x8x4xbf16, #tpu.memory_space<vmem>>, vector<1x8x4xbf16>
    %1 = vector.shape_cast %0 : vector<1x8x4xbf16> to vector<8x4xbf16>
    %c0_2 = arith.constant 0 : index
    %c0_3 = arith.constant 0 : index
    %c0_4 = arith.constant 0 : index
    %2 = vector.load %arg2[%c0_2, %c0_3, %c0_4] : memref<1x4x128xbf16, #tpu.memory_space<vmem>>, vector<1x4x128xbf16>
    %3 = vector.shape_cast %2 : vector<1x4x128xbf16> to vector<4x128xbf16>
    %cst = arith.constant dense<0.000000e+00> : vector<8x128xf32>
    %4 = tpu.matmul %1, %3, %cst {dimension_numbers = #tpu.dot_dimension_numbers<[1], [0], [0], [1], [0, 0, 1, 1], [], []>} : vector<8x4xbf16>, vector<4x128xbf16>, vector<8x128xf32> -> vector<8x128xf32>
    %c0_5 = arith.constant 0 : index
    %c0_6 = arith.constant 0 : index
    %5 = vector.load %arg4[%c0_5, %c0_6] : memref<8x1xf32, #tpu.memory_space<vmem>>, vector<8x1xf32>
    %6 = vector.broadcast %5 : vector<8x1xf32> to vector<8x128xf32>
    %7 = arith.addf %4, %6 : vector<8x128xf32>
    %cst_7 = arith.constant 0.000000e+00 : f32
    %8 = vector.broadcast %cst_7 : f32 to vector<8x128xf32>
    %9 = arith.subf %8, %7 : vector<8x128xf32>
    %10 = math.exp %9 : vector<8x128xf32>
    %cst_8 = arith.constant 1.000000e+00 : f32
    %11 = vector.broadcast %cst_8 : f32 to vector<8x128xf32>
    %12 = arith.addf %11, %10 : vector<8x128xf32>
    %13 = tpu.reciprocal %12 {approx = true} : vector<8x128xf32> -> vector<8x128xf32>
    %14 = arith.mulf %7, %13 : vector<8x128xf32>
    %c0_9 = arith.constant 0 : index
    %c0_10 = arith.constant 0 : index
    %c0_11 = arith.constant 0 : index
    %15 = vector.load %arg5[%c0_9, %c0_10, %c0_11] : memref<1x8x128xf32, #tpu.memory_space<vmem>>, vector<1x8x128xf32>
    %16 = vector.shape_cast %15 : vector<1x8x128xf32> to vector<8x128xf32>
    %17 = vector.shape_cast %14 : vector<8x128xf32> to vector<1x8x128xf32>
    tpu.vector_store %arg5[%c0_9, %c0_10, %c0_11], %17 {strides = array<i32>} : memref<1x8x128xf32, #tpu.memory_space<vmem>>, vector<1x8x128xf32>,
    return
  }
  func.func @transform_0(%arg0: i32, %arg1: i32) -> (i32, i32, i32) {
    %c0_i32 = arith.constant 0 : i32
    %c0_i32_0 = arith.constant 0 : i32
    return %arg0, %c0_i32, %arg1 : i32, i32, i32
  }
  func.func @transform_1(%arg0: i32, %arg1: i32) -> (i32, i32, i32) {
    %c0_i32 = arith.constant 0 : i32
    %c0_i32_0 = arith.constant 0 : i32
    %c0_i32_1 = arith.constant 0 : i32
    %c0_i32_2 = arith.constant 0 : i32
    return %c0_i32, %c0_i32_0, %c0_i32_1 : i32, i32, i32
  }
  func.func @transform_2(%arg0: i32, %arg1: i32) -> (i32, i32) {
    %c0_i32 = arith.constant 0 : i32
    %c0_i32_0 = arith.constant 0 : i32
    %c0_i32_1 = arith.constant 0 : i32
    return %c0_i32, %c0_i32_0 : i32, i32
  }
  func.func @transform_3(%arg0: i32, %arg1: i32) -> (i32, i32, i32) {
    %c0_i32 = arith.constant 0 : i32
    %c0_i32_0 = arith.constant 0 : i32
    return %arg0, %c0_i32, %arg1 : i32, i32, i32
  }
}

</mosaic_0001>

<bundles_post_ra>
// kernel: tpu_custom_call.1
= control target key start
LH: loop header
LB: loop body
LE: loop exit
PB: predicated region body
PF: predicated region fallthrough
CT: control target
= control target key end

     0   :  { %8 = vsyncpa [#allocation3], 0  ;;  %s663_s0 = inlined_call_operand.vmem [shape: bf16[2,4,256], index: 0, kind: input, shape index: {}]   ;;  %s664_s1 = inlined_call_operand.vmem [shape: bf16[1,8,4], index: 1, kind: input, shape index: {}]   ;;  %s665_s2 = inlined_call_operand.vmem [shape: f32[8,1], index: 2, kind: input, shape index: {}]   ;;  %s666_s3 = inlined_call_operand.hbm [shape: f32[2,8,256], index: 3, kind: output, shape index: {}]  }
   0x1   :  { %10 = vsyncpa [#allocation3 + $0x1], 0  ;;  %s535_s12 = smov 0   ;;  %s537_s13 = smov 0  }
   0x2   :  { %s539_s14 = smov 0   ;;  %s541_s15 = smov 0  }
   0x3   :  { %s543_s16 = smov 0   ;;  %s545_s17 = smov 0  }
   0x4   :  { %s547_s18 = smov 0   ;;  %s549_s19 = smov 0  }
   0x5 LB: > { %s327_s20 = sadd.s32 4294967295, %s512_s19   ;;  %s328_s21 = sadd.s32 4294967294, %s512_s19   ;;  %s512_s19 = sphi %s549_s19, %s16_s19   ;;  %s508_s18 = sphi %s547_s18, %s675_s18   ;;  %s504_s17 = sphi %s545_s17, %s674_s17   ;;  %s500_s16 = sphi %s543_s16, %s673_s16   ;;  %s496_s15 = sphi %s541_s15, %s672_s15   ;;  %s492_s14 = sphi %s539_s14, %s671_s14   ;;  %s488_s13 = sphi %s537_s13, %s670_s13   ;;  %s484_s12 = sphi %s535_s12, %s669_s12  }
   0x6   : > { %s25_s22 = sadd.s32 1, %s504_s17  ;;  %s28_s23 = sadd.s32 1, %s508_s18 }
   0x7   : > { %p26_p0 = scmp.ge.s32.totalorder %s25_s22, 2  ;;  %p117_p1 = scmp.ne.s32.totalorder %s492_s14, %s488_s13 }
   0x8   : > { %p118_p2 = scmp.eq.s32.totalorder %s327_s20, 3  ;;  %p123_p5 = scmp.ne.s32.totalorder %s488_s13, %s484_s12 }
   0x9   : > { %s677_s22 = smov (%p26_p0, %s25_s22), 0  ;;  %s679_s23 = smov (!%p26_p0, %s28_s23), %s508_s18 }
   0xa   : > { %s103_s24 = ssub.s32 %s504_s17, %s677_s22  ;;  %p586_p3 = por %p118_p2, %p117_p1 }
   0xb   : > { %p30_p4 = scmp.ge.s32.totalorder %s679_s23, 2  ;;  %p124_p6 = scmp.eq.s32.totalorder %s328_s21, 3 }
   0xc   : > { %p331_p7 = scmp.ge.s32.totalorder %s512_s19, 1  ;;  %p159_p9 = scmp.lt.s32.totalorder %s512_s19, 5 }
   0xd   : > { %s681_s23 = smov (%p30_p4, %s679_s23), 0  ;;  %p595_p8 = por %p124_p6, %p123_p5 }
   0xe   : > { %s102_s27 = ssub.s32 %s508_s18, %s681_s23  ;;  %s107_s28 = sadd.s32 1, %s492_s14 }
   0xf   : > { %s104_s29 = sor.u32 %s103_s24, %s102_s27  ;;  %p160_p10 = pnand %p331_p7, %p159_p9 }
  0x10   : > { %p105_p11 = scmp.eq.s32.totalorder %s104_s29, 0  ;;  %p186_p12 = scmp.lt.s32.totalorder (!%p160_p10), %s500_s16, 1 }
  0x11   : > { %163 = sbr.rel (%p160_p10) target bundleno = 186 (0xba), region = 32  ;;  %p188_p13 = scmp.lt.s32.totalorder (!%p160_p10), %s496_s15, 1 }
  0x12   : > { %s604_s30 = scalar_select %p105_p11, %s492_s14, %s107_s28  }
  0x13   : > { %s337_s28 = sshll.u32 (!%p160_p10), %s500_s16, 1  ;;  %s183_s29 = sand.u32 (!%p160_p10), 1, %s488_s13  }
  0x14   : > { %s242_s4 = sadd.s32 (!%p160_p10), %s496_s15, %s337_s28  ;;  %s332_s5 = sshll.u32 (!%p160_p10), %s183_s29, 3 }
  0x15   : > { %s438_s28 = scalar_lea.hbm (!%p160_p10), %s666_s3, 32 }
  0x16   : > { %v197_v0 = vld [vmem:[%s665_s2] sm:$0xff]  ;;  %s187_s6 = scalar_select %p186_p12, %s500_s16, 1  ;;  %v514_v1 = vmov 0   ;;  %vm207_vm0 = vcmask 1041408   ;;  %vm203_vm1 = vcmask 31744  }
  0x17   : > { %413 = vset.pattern.permute.xlu0 %v514_v1  ;;  %s189_s7 = scalar_select %p188_p13, %s496_s15, 1  ;;  %v195_v4 = vld [vmem:[%s664_s1] sm:$0xf] }
  0x18   : > { %200 = vperm.xlu0 %413, %v197_v0   ;;  %s333_s8 = sshll.u32 %s187_s6, 1  ;;  %s338_s6 = sshll.u32 %s242_s4, 3 }
  0x19   : > { %s191_s9 = sadd.s32 %s333_s8, %s189_s7  ;;  %s232_s16 = scalar_lea.sflag [#allocation3], %s183_s29 }
  0x1a   : > { %s334_s10 = sshll.u32 %s191_s9, 1  ;;  %s244_s9 = scalar_lea.hbm %s666_s3, %s338_s6 }
  0x1b   : > { %s193_s21 = scalar_lea.vmem %s663_s0, %s334_s10  ;;  %s185_s10 = scalar_lea.vmem [#allocation2], %s332_s5 }
  0x1c   : > { %v196_v2 = vld [vmem:[%s193_s21] sm:$0x3]  ;;  %s246_s11 = sshll.u32 %s185_s10, 4  ;;  %s248_s20 = sshll.u32 %s244_s9, 4  ;;  %s247_s11 = int_to_ptr.vmem [resolvable:$true] %s246_s11  ;;  %s249_s20 = int_to_ptr.hbm [resolvable:$true] %s248_s20 }
  0x1d   : > { %v209_v3 = vsel %vm207_vm0, %v196_v2, 0  ;;  %s432_s15 = sshra.s32 %s249_s20, 4  ;;  %s433_s15 = int_to_ptr.hbm [resolvable:$true] %s432_s15 }
  0x1e   : > { %218 = vmatpush.bf16.msra.mxu0 %v209_v3  ;;  %s434_s21 = scalar_lea.hbm %s433_s15, 8  ;;  %p439_p4 = scmp.lt.s32.totalorder %s433_s15, %s666_s3 }
  0x1f   : > { %p435_p0 = scmp.ne.s32.totalorder %s433_s15, %s434_s21  ;;  %p440_p5 = scmp.lt.s32.totalorder %s438_s28, %s434_s21 }
  0x21   : > { %335 = vmatmul.msk.bf16.vlgmr.msra.gmra.mxu0 %vm203_vm1, %v195_v4  ;;  %p436_p1 = pnand %p435_p0, %p586_p3  ;;  %p441_p6 = por %p440_p5, %p439_p4 }
  0x23   : > { %p437_p2 = pneg %p436_p1 }
  0x25   : > { %p442_p7 = pnand %p441_p6, %p437_p2 }
  0x8a   : > { %v201_v5 = vpop.permute.xlu0 %200 }
  0x9e   : > { %v220_v6 = vpop.f32.mrf.mxu0 }
  0x9f   : > { %v221_v7 = vadd.f32 %v220_v6, %v201_v5 }
  0xa1   : > { %v224_v8 = vsub.f32 0.0, %v221_v7 }
  0xa3   : > { %v225_v9 = vmul.f32 1.442695, %v224_v8 }
  0xa5   : > { %414 = vpow2.f32 %v225_v9 }
  0xa6   : > { %v222_v10 = vpop.f32.mrf.mxu0 }
  0xab   : > { %v415_v11 = vpop.eup %414 }
  0xac   : > { %v227_v12 = vadd.f32 1.0, %v415_v11 }
  0xae   : > { %416 = vrcp.f32 %v227_v12 }
  0xb4   : > { %v417_v13 = vpop.eup %416 }
  0xb5   : > { %v229_v14 = vmul.f32 %v417_v13, %v221_v7 }
  0xb7   : > { %230 = vst [vmem:[%s185_s10] sm:$0xff] %v229_v14 }
  0xb8   : > { %445 = shalt.err (!%p442_p7)
}
  0xb9   : > { %341 = dma.vmem_to_hbm [thread:$0]  (%p586_p3), %s247_s11, 128, %s249_s20, %s232_s16  }
  0xba PF: > { %p347_p9 = scmp.ge.s32.totalorder %s512_s19, 2  ;;  %s260_s29 = sand.u32 1, %s484_s12  }
  0xbb   : > { %s261_s6 = scalar_lea.sflag [#allocation3], %s260_s29 }
  0xbc   : > { %p344_p10 = pnand %p347_p9, %p595_p8 }
  0xbe   : > { %p345_p11 = pneg %p344_p10 }
  0xc0   : > { %479 = dma.done.wait (%p345_p11), %s261_s6, 128  }
  0xc1   : > { %481 = vsyncadd (%p345_p11), %s261_s6, 4294967168  ;;  %s16_s19 = sadd.s32 1, %s512_s19   ;;  %s669_s12 = smov %s488_s13 }
  0xc2   : > { %p13_p12 = scmp.ge.s32.totalorder %s16_s19, 6   ;;  %s670_s13 = smov %s492_s14 }
  0xc3   : > { %s671_s14 = smov %s604_s30  ;;  %s672_s15 = smov %s504_s17 }
  0xc4   : > { %s673_s16 = smov %s508_s18  ;;  %s674_s17 = smov %s677_s22 }
  0xc5   : > { %s675_s18 = smov %s681_s23  ;;  %15 = sbr.rel (!%p13_p12) target bundleno = 5 (0x5), region = 67 }
  0xca   :  { %267 = vsyncpa [#allocation3], 1 }
  0xcb   :  { %269 = vsyncpa [#allocation3 + $0x1], 1 }

</bundles_post_ra>
